<compile_context>
chip_gen: v6e
topology: v6e:2x2x1
jax: 0.10.0
libtpu: 0.0.40
codegen_flags: <defaults>
</compile_context>

<pallas_src>
import jax
import jax.numpy as jnp
from jax.experimental import pallas as pl
from jax.experimental.pallas import tpu as pltpu


# ---------------------------------------------------------------------------
# Kernels
# ---------------------------------------------------------------------------

def _packed_kernel(x_ref, w_ref, o_ref):
    """Flat path: rows = 2*N*C packed as [real(batch,chan); imag(batch,chan)].

    x_ref: (2*N*C, hw_tile)   packed stacked-complex activations
    w_ref: (2*N*C, 2*N*C)     [[I(x)wr, -I(x)wi], [I(x)wi, I(x)wr]]  (resident)
    o_ref: (2*N*C, hw_tile)
    """
    y = jnp.dot(w_ref[...], x_ref[...], preferred_element_type=jnp.float32)
    # ReLUCmplx(relu_type='c'): independent ReLU on real and imag rows.
    o_ref[...] = jnp.maximum(y, 0.0).astype(o_ref.dtype)
    # TODO(synk): nn.Dropout(p=0.0) is the identity (and a no-op in eval); omitted.


def _grouped_kernel(x_ref, wr_ref, wi_ref, o_ref):
    """Grouped path (large batch): Nb batches folded per block, parts kept separate.

    x_ref:  (2, Nb*C, hw_tile)
    wr_ref: (Nb*C, Nb*C) = I (x) wr     wi_ref: (Nb*C, Nb*C) = I (x) wi  (resident)
    o_ref:  (2, Nb*C, hw_tile)
    """
    xr = x_ref[0]
    xi = x_ref[1]
    wr = wr_ref[...]
    wi = wi_ref[...]
    yr = (jnp.dot(wr, xr, preferred_element_type=jnp.float32)
          - jnp.dot(wi, xi, preferred_element_type=jnp.float32))
    yi = (jnp.dot(wi, xr, preferred_element_type=jnp.float32)
          + jnp.dot(wr, xi, preferred_element_type=jnp.float32))
    o_ref[0] = jnp.maximum(yr, 0.0).astype(o_ref.dtype)
    o_ref[1] = jnp.maximum(yi, 0.0).astype(o_ref.dtype)


# ---------------------------------------------------------------------------
# Tiling heuristics
# ---------------------------------------------------------------------------

_TARGET_BLOCK_BYTES = 4 << 20   # ~4 MiB of x per step -> >=8 MiB (in+out) per step
_MAX_BLOCK_BYTES = 6 << 20      # keep double-buffered x+y (+f32 temp) well under 64 MiB
_MXU_ROW_CAP = 64               # cap packed K so block-diagonal zero padding never
                                # turns this HBM-bound op into an MXU-bound one


def _pick_hw_tile(HW, rows, itemsize):
    """Largest lane-dense tile (multiple of 128, or the full spatial extent) that
    hits the per-step byte target without exceeding the VMEM-derived cap."""
    want = max(128, _TARGET_BLOCK_BYTES // (rows * itemsize))
    cap = max(128, _MAX_BLOCK_BYTES // (rows * itemsize))
    tile = min(HW, want, cap)
    if tile < HW:
        tile = max(128, (tile // 128) * 128)   # lane-dense (no masked vst.msk)
    return int(tile)


def _maybe_split_for_megacore(HW, hw_tile, rows, itemsize, n_other_steps):
    """Keep >=2 grid steps for big problems so both v7x TensorCores get work and
    double buffering has something to hide; tiny problems stay single-step."""
    if pl.cdiv(HW, hw_tile) * n_other_steps > 1:
        return hw_tile
    if rows * hw_tile * itemsize < (1 << 20) or hw_tile < 256:
        return hw_tile
    return max(128, ((hw_tile // 2) // 128) * 128)


# ---------------------------------------------------------------------------
# Weight packing (tiny, built once in the wrapper, resident across the grid)
# ---------------------------------------------------------------------------

def _block_weights(w2, nb, dtype):
    """w2: (2, C, C) complex 1x1 conv weight -> (I_nb (x) wr, I_nb (x) wi)."""
    eye = jnp.eye(nb, dtype=dtype)
    wr = jnp.kron(eye, w2[0].astype(dtype))
    wi = jnp.kron(eye, w2[1].astype(dtype))
    return wr, wi


def _packed_weight(w2, nb, dtype):
    """[[I(x)wr, -I(x)wi], [I(x)wi, I(x)wr]] of shape (2*nb*C, 2*nb*C)."""
    wr, wi = _block_weights(w2, nb, dtype)
    top = jnp.concatenate([wr, -wi], axis=1)
    bot = jnp.concatenate([wi, wr], axis=1)
    return jnp.concatenate([top, bot], axis=0)


# ---------------------------------------------------------------------------
# Wrapper
# ---------------------------------------------------------------------------

def linear_conv_block(x, w):
    """LinearConvBlock forward.

    x: (2, N, C, H, W) stacked-complex activations.
    w: (2, C, C, 1, 1) stacked-complex 1x1 conv weight.
    Returns (2, N, C, H, W) of the same dtype as x.
    """
    assert x.ndim == 5 and x.shape[0] == 2
    two, N, C, H, W = x.shape
    assert w.shape == (2, C, C, 1, 1)
    HW = H * W
    itemsize = jnp.dtype(x.dtype).itemsize
    w2 = w[:, :, :, 0, 0]   # (2, C, C)

    # ---- choose batch folding ------------------------------------------------
    # Flat path: fold real/imag x batch x channel into one row axis (one dot,
    # fully packed vregs, single lane-dense load/store per vreg).
    # Grouped path (large batch): keep real/imag separate, fold Nb batches per
    # block so rows are a full multiple of 8 sublanes and steps stay >= MiB.
    flat_rows = 2 * N * C
    if flat_rows <= _MXU_ROW_CAP:
        use_flat = True
    else:
        k_cap = max(_MXU_ROW_CAP, 2 * C)
        cands = [g for g in range(1, N + 1)
                 if N % g == 0 and (g * C) % 8 == 0 and 2 * g * C <= k_cap]
        if cands:
            use_flat, nb = False, max(cands)
        else:
            use_flat = True   # rare awkward shapes: fold everything anyway

    if use_flat:
        rows = flat_rows
        x2 = x.reshape(rows, HW)                   # free contiguous reshape
        w_big = _packed_weight(w2, N, x.dtype)     # (rows, rows), tiny
        hw_tile = _pick_hw_tile(HW, rows, itemsize)
        hw_tile = _maybe_split_for_megacore(HW, hw_tile, rows, itemsize, 1)
        grid = (pl.cdiv(HW, hw_tile),)

        block_bytes = rows * hw_tile * itemsize
        temp_f32 = rows * hw_tile * 4
        vmem_limit = int(4 * block_bytes + temp_f32
                         + 2 * w_big.size * itemsize + (2 << 20))

        y = pl.pallas_call(
            _packed_kernel,
            out_shape=jax.ShapeDtypeStruct((rows, HW), x.dtype),
            grid_spec=pltpu.PrefetchScalarGridSpec(
                num_scalar_prefetch=0,
                grid=grid,
                in_specs=[
                    pl.BlockSpec((rows, hw_tile), lambda s: (0, s)),
                    pl.BlockSpec((rows, rows), lambda s: (0, 0)),
                ],
                out_specs=pl.BlockSpec((rows, hw_tile), lambda s: (0, s)),
            ),
            compiler_params=pltpu.CompilerParams(
                dimension_semantics=("parallel",),
                vmem_limit_bytes=vmem_limit,
            ),
        )(x2, w_big)
        return y.reshape(2, N, C, H, W)

    # ---- grouped (large-batch) path -------------------------------------------
    rows = nb * C                                   # multiple of 8 by construction
    x2 = x.reshape(2, N * C, HW)                    # free contiguous reshape
    wr_bd, wi_bd = _block_weights(w2, nb, x.dtype)  # (rows, rows) each
    n_groups = N // nb
    hw_tile = _pick_hw_tile(HW, 2 * rows, itemsize)
    hw_tile = _maybe_split_for_megacore(HW, hw_tile, 2 * rows, itemsize, n_groups)
    grid = (n_groups, pl.cdiv(HW, hw_tile))

    block_bytes = 2 * rows * hw_tile * itemsize
    temp_f32 = 2 * rows * hw_tile * 4
    vmem_limit = int(4 * block_bytes + temp_f32
                     + 4 * rows * rows * itemsize + (2 << 20))

    y = pl.pallas_call(
        _grouped_kernel,
        out_shape=jax.ShapeDtypeStruct((2, N * C, HW), x.dtype),
        grid_spec=pltpu.PrefetchScalarGridSpec(
            num_scalar_prefetch=0,
            grid=grid,
            in_specs=[
                pl.BlockSpec((2, rows, hw_tile), lambda g, s: (0, g, s)),
                pl.BlockSpec((rows, rows), lambda g, s: (0, 0)),
                pl.BlockSpec((rows, rows), lambda g, s: (0, 0)),
            ],
            out_specs=pl.BlockSpec((2, rows, hw_tile), lambda g, s: (0, g, s)),
        ),
        compiler_params=pltpu.CompilerParams(
            dimension_semantics=("parallel", "parallel"),
            vmem_limit_bytes=vmem_limit,
        ),
    )(x2, wr_bd, wi_bd)
    return y.reshape(2, N, C, H, W)


# ---------------------------------------------------------------------------
# Demo / correctness check
# ---------------------------------------------------------------------------

if __name__ == "__main__":
    key = jax.random.PRNGKey(0)
    kx, kwr, kwi, kx2 = jax.random.split(key, 4)

    def reference(x, w):
        wr = w[0, :, :, 0, 0]
        wi = w[1, :, :, 0, 0]

        def conv1x1(a, wm):   # a: (N, C, H, W), wm: (Cout, Cin)
            return jnp.einsum("nchw,oc->nohw", a, wm)

        yr = jnp.maximum(conv1x1(x[0], wr) - conv1x1(x[1], wi), 0.0)
        yi = jnp.maximum(conv1x1(x[0], wi) + conv1x1(x[1], wr), 0.0)
        return jnp.stack([yr, yi], axis=0)

    # Small shapes consistent with the module: batch=2, channels=4, 16x16 spatial.
    N, C, H, W = 2, 4, 16, 16
    x = jax.random.normal(kx, (2, N, C, H, W), dtype=jnp.float32)
    w = jnp.stack(
        [0.5 * jax.random.normal(kwr, (C, C, 1, 1), dtype=jnp.float32),
         0.5 * jax.random.normal(kwi, (C, C, 1, 1), dtype=jnp.float32)],
        axis=0,
    )

    out = jax.block_until_ready(linear_conv_block(x, w))          # flat packed path
    ref = reference(x, w)
    assert out.shape == x.shape
    assert jnp.allclose(out, ref, atol=1e-5, rtol=1e-5), \
        float(jnp.max(jnp.abs(out - ref)))

    # Also exercise the large-batch grouped (block-diagonal) path.
    N2, H2, W2 = 16, 8, 8
    x_big = jax.random.normal(kx2, (2, N2, C, H2, W2), dtype=jnp.float32)
    out2 = jax.block_until_ready(linear_conv_block(x_big, w))
    ref2 = reference(x_big, w)
    assert out2.shape == x_big.shape
    assert jnp.allclose(out2, ref2, atol=1e-5, rtol=1e-5), \
        float(jnp.max(jnp.abs(out2 - ref2)))

    print("KERNEL_OK")
</pallas_src>

<mosaic_0001>
module attributes {stable_mosaic.version = 11 : i64} {
  func.func @_packed_kernel(%arg0: i32, %arg1: memref<16x256xf32, #tpu.memory_space<vmem>>, %arg2: memref<16x16xf32, #tpu.memory_space<vmem>>, %arg3: memref<16x256xf32, #tpu.memory_space<vmem>>) attributes {dimension_semantics = [#tpu.dimension_semantics<parallel>], iteration_bounds = array<i64: 1>, scalar_prefetch = 0 : i64, scratch_operands = 0 : i64, tpu.core_type = #tpu.core_type<tc>, window_params = [{transform_indices = @transform_0, window_bounds = array<i64: 16, 256>}, {pipeline_mode = #tpu.pipeline_mode<synchronous>, transform_indices = @transform_1, window_bounds = array<i64: 16, 16>}, {transform_indices = @transform_2, window_bounds = array<i64: 16, 256>}]} {
    %c0 = arith.constant 0 : index
    %c0_0 = arith.constant 0 : index
    %0 = vector.load %arg2[%c0, %c0_0] : memref<16x16xf32, #tpu.memory_space<vmem>>, vector<16x16xf32>
    %c0_1 = arith.constant 0 : index
    %c0_2 = arith.constant 0 : index
    %1 = vector.load %arg1[%c0_1, %c0_2] : memref<16x256xf32, #tpu.memory_space<vmem>>, vector<16x256xf32>
    %cst = arith.constant dense<0.000000e+00> : vector<16x256xf32>
    %2 = tpu.matmul %0, %1, %cst {dimension_numbers = #tpu.dot_dimension_numbers<[1], [0], [0], [1], [0, 0, 1, 1], [], []>} : vector<16x16xf32>, vector<16x256xf32>, vector<16x256xf32> -> vector<16x256xf32>
    %cst_3 = arith.constant 0.000000e+00 : f32
    %3 = vector.broadcast %cst_3 : f32 to vector<16x256xf32>
    %4 = arith.maximumf %2, %3 : vector<16x256xf32>
    %c0_4 = arith.constant 0 : index
    %c0_5 = arith.constant 0 : index
    %5 = vector.load %arg3[%c0_4, %c0_5] : memref<16x256xf32, #tpu.memory_space<vmem>>, vector<16x256xf32>
    tpu.vector_store %arg3[%c0_4, %c0_5], %4 {strides = array<i32>} : memref<16x256xf32, #tpu.memory_space<vmem>>, vector<16x256xf32>,
    return
  }
  func.func @transform_0(%arg0: i32) -> (i32, i32) {
    %c0_i32 = arith.constant 0 : i32
    %c0_i32_0 = arith.constant 0 : i32
    return %c0_i32, %arg0 : i32, i32
  }
  func.func @transform_1(%arg0: i32) -> (i32, i32) {
    %c0_i32 = arith.constant 0 : i32
    %c0_i32_0 = arith.constant 0 : i32
    %c0_i32_1 = arith.constant 0 : i32
    return %c0_i32, %c0_i32_0 : i32, i32
  }
  func.func @transform_2(%arg0: i32) -> (i32, i32) {
    %c0_i32 = arith.constant 0 : i32
    %c0_i32_0 = arith.constant 0 : i32
    return %c0_i32, %arg0 : i32, i32
  }
}

</mosaic_0001>

<bundles_post_ra>
// kernel: tpu_custom_call.1
= control target key start
LH: loop header
LB: loop body
LE: loop exit
PB: predicated region body
PF: predicated region fallthrough
CT: control target
= control target key end

     0   :  { %7 = vsyncpa [#allocation3], 0  ;;  %s274_s0 = inlined_call_operand.hbm [shape: f32[16,256], index: 0, kind: input, shape index: {}]   ;;  %s275_s1 = inlined_call_operand.hbm [shape: f32[16,16], index: 1, kind: input, shape index: {}]   ;;  %s276_s2 = inlined_call_operand.hbm [shape: f32[16,256], index: 2, kind: output, shape index: {}]  }
   0x1   :  { %8 = vsyncpa [#allocation6], 0 }
   0x2   :  { %9 = vsyncpa [#allocation4], 0  ;;  %s236_s9 = smov [#allocation2]  }
   0x3   :  { %s15_s10 = sshll.u32 %s236_s9, 4  ;;  %s16_s10 = int_to_ptr.vmem [resolvable:$true] %s15_s10 }
   0x4   :  { %s178_s11 = scalar_lea.vmem %s16_s10, 512  ;;  %p183_p1 = scmp.lt.s32.totalorder %s16_s10, %s16_s10 }
   0x5   :  { %p179_p0 = scmp.ne.s32.totalorder %s16_s10, %s178_s11  ;;  %p184_p2 = scmp.lt.s32.totalorder %s178_s11, %s178_s11 }
   0x7   :  { %p185_p3 = por %p184_p2, %p183_p1 }
   0x9   :  { %p186_p4 = pnand %p185_p3, %p179_p0 }
   0xb   :  { %189 = shalt.err (!%p186_p4)
}
   0xc   :  { %s237_s12 = smov 256   ;;  %s238_s13 = smov 16  }
   0xd   :  { %21 = dma.hbm_to_vmem [thread:$0]  %s274_s0, 512, %s16_s10, [#allocation3], %s237_s12, %s237_s12, %s238_s13  }
   0xe   :  { %s239_s16 = smov [#allocation5]  }
   0xf   :  { %s27_s17 = sshll.u32 %s239_s16, 4  ;;  %s28_s17 = int_to_ptr.vmem [resolvable:$true] %s27_s17 }
  0x10   :  { %s198_s18 = scalar_lea.vmem %s28_s17, 256  ;;  %p203_p6 = scmp.lt.s32.totalorder %s28_s17, %s28_s17 }
  0x11   :  { %p199_p5 = scmp.ne.s32.totalorder %s28_s17, %s198_s18  ;;  %p204_p7 = scmp.lt.s32.totalorder %s198_s18, %s198_s18 }
  0x13   :  { %p205_p8 = por %p204_p7, %p203_p6 }
  0x15   :  { %p206_p9 = pnand %p205_p8, %p199_p5 }
  0x17   :  { %209 = shalt.err (!%p206_p9)
}
  0x18   :  { %s240_s19 = smov 128   ;;  %s241_s20 = smov 8  }
  0x19   :  { %33 = dma.hbm_to_vmem [thread:$0]  %s275_s1, 256, %s28_s17, [#allocation6], %s240_s19, %s240_s19, %s241_s20  }
  0x1a   :  { %230 = dma.done.wait [#allocation3], 512  }
  0x1b   :  { %231 = vsyncadd [#allocation3], 4294966784 }
  0x1c   :  { %232 = dma.done.wait [#allocation6], 256  }
  0x1d   :  { %233 = vsyncadd [#allocation6], 4294967040  ;;  %v242_v0 = vmov 0.0   ;;  %v45_v1 = vld [vmem:[#allocation2 + $0x18] sm:$0xff]  ;;  %v44_v2 = vld [vmem:[#allocation2 + $0x10] sm:$0xff]  ;;  %vm46_vm0 = vcmask 130048  }
  0x1e   :  { %117 = vmatprep.mubr.f32.mxu0 %v242_v0  ;;  %123 = vmatprep.mubr.f32.mxu1 %v242_v0  ;;  %v43_v3 = vld [vmem:[#allocation2 + $0x8] sm:$0xff]  ;;  %v42_v4 = vld [vmem:[#allocation2] sm:$0xff]  ;;  %s243_s0 = smov [#allocation7]  }
  0x1f   :  { %81 = vmatprep.subr.mxu0 %v45_v1  ;;  %158 = vmatprep.subr.mxu1 %v45_v1  ;;  %v40_v5 = vld [vmem:[#allocation5] sm:$0xff]  ;;  %v41_v6 = vld [vmem:[#allocation5 + $0x8] sm:$0xff]  ;;  %s143_s1 = sshll.u32 %s243_s0, 4  ;;  %s144_s1 = int_to_ptr.vmem [resolvable:$true] %s143_s1 }
  0x20   :  { %82 = vmatpush1.msra.mxu0 %v44_v2  ;;  %160 = vmatpush1.msra.mxu1 %v44_v2  ;;  %s210_s23 = scalar_lea.vmem %s144_s1, 512  ;;  %p215_p11 = scmp.lt.s32.totalorder %s144_s1, %s144_s1 }
  0x21   :  { %83 = vmatprep.subr.mxu0 %v43_v3  ;;  %159 = vmatprep.subr.mxu1 %v43_v3  ;;  %p211_p10 = scmp.ne.s32.totalorder %s144_s1, %s210_s23  ;;  %p216_p12 = scmp.lt.s32.totalorder %s210_s23, %s210_s23 }
  0x22   :  { %84 = vmatpush1.msra.mxu0 %v42_v4  ;;  %161 = vmatpush1.msra.mxu1 %v42_v4 }
  0x23   :  { %156 = vmatmul.mubr.msk.f32.vlgmr.msra.gmra.mxu0 %vm46_vm0, %v40_v5  ;;  %157 = vmatmul.mubr.msk.f32.vlgmr.msra.gmra.mxu1 %vm46_vm0, %v41_v6  ;;  %p217_p13 = por %p216_p12, %p215_p11 }
  0x25   :  { %p218_p0 = pnand %p217_p13, %p211_p10 }
  0xe3   :  { %v119_v7 = vpop.f32.mrf.mxu0  ;;  %v125_v8 = vpop.f32.mrf.mxu1 }
  0xe4   :  { %v130_v9 = vmax.f32 %v119_v7, 0.0  ;;  %v132_v10 = vmax.f32 %v125_v8, 0.0 }
  0xe5   :  { %v121_v11 = vpop.f32.mrf.mxu0  ;;  %v127_v12 = vpop.f32.mrf.mxu1 }
  0xe6   :  { %134 = vst [vmem:[#allocation7] sm:$0xff] %v130_v9  ;;  %136 = vst [vmem:[#allocation7 + $0x10] sm:$0xff] %v132_v10  ;;  %v131_v13 = vmax.f32 %v121_v11, 0.0  ;;  %v133_v14 = vmax.f32 %v127_v12, 0.0 }
  0xe8   :  { %135 = vst [vmem:[#allocation7 + $0x8] sm:$0xff] %v131_v13  ;;  %137 = vst [vmem:[#allocation7 + $0x18] sm:$0xff] %v133_v14 }
  0xe9   :  { %221 = shalt.err (!%p218_p0)
}
  0xea   :  { %149 = dma.vmem_to_hbm [thread:$0]  %s144_s1, 512, %s276_s2, [#allocation4], %s237_s12, %s237_s12, %s238_s13  }
  0xeb   :  { %234 = dma.done.wait [#allocation4], 512  }
  0xec   :  { %235 = vsyncadd [#allocation4], 4294966784 }
  0xed   :  { %153 = vsyncpa [#allocation3], 1 }
  0xee   :  { %154 = vsyncpa [#allocation6], 1 }
  0xef   :  { %155 = vsyncpa [#allocation4], 1 }

</bundles_post_ra>
